<compile_context>
chip_gen: v5e
topology: v5e:2x2
jax: 0.10.0
libtpu: 0.0.40
codegen_flags: <defaults>
</compile_context>

<pallas_src>
import functools
import math

import jax
import jax.numpy as jnp
from jax import lax
from jax.experimental import pallas as pl
from jax.experimental.pallas import tpu as pltpu

_MIN_ROW_TILE = 16  # sublane-safe for both f32 and in-kernel bf16 casts


# --------------------------------------------------------------------------- #
# Kernel
# --------------------------------------------------------------------------- #
def _head_transform_kernel(x_ref, w_ref, b_ref, g_ref, beta_ref, o_ref,
                           *, eps, mxu_dtype, approximate_gelu, hidden):
    # ---- dense: x @ W + b (MXU, bf16 operands, f32 accumulate) ----
    x = x_ref[...]
    if mxu_dtype is not None and x.dtype != mxu_dtype:
        x = x.astype(mxu_dtype)            # in-kernel cast (VPU, overlaps MXU)
    h = jnp.dot(x, w_ref[...], preferred_element_type=jnp.float32)
    h = h + b_ref[...]                      # bias in f32

    # ---- activation ----
    if approximate_gelu:
        # tanh-approx GELU: transcendental goes to the (otherwise idle) EUP slot.
        c = math.sqrt(2.0 / math.pi)
        h = 0.5 * h * (1.0 + jnp.tanh(c * (h + 0.044715 * (h * h * h))))
    else:
        # exact erf GELU, matching torch.nn.functional.gelu default
        h = 0.5 * h * (1.0 + lax.erf(h * (1.0 / math.sqrt(2.0))))

    # ---- one-pass LayerNorm over the hidden (last) axis ----
    # Statistics kept in f32; var via E[h^2] - mean^2 with a cancellation guard.
    inv_h = 1.0 / hidden
    s1 = jnp.sum(h, axis=-1, keepdims=True)
    s2 = jnp.sum(h * h, axis=-1, keepdims=True)
    mean = s1 * inv_h
    var = jnp.maximum(s2 * inv_h - mean * mean, 0.0)
    inv = lax.rsqrt(var + eps)
    y = (h - mean) * inv * g_ref[...] + beta_ref[...]   # gamma/beta in f32

    o_ref[...] = y.astype(o_ref.dtype)


# --------------------------------------------------------------------------- #
# Tiling / VMEM helpers
# --------------------------------------------------------------------------- #
def _round_up(x, m):
    return ((x + m - 1) // m) * m


def _round_down(x, m):
    return (x // m) * m


def _vmem_capacity_bytes():
    try:
        return int(pltpu.get_tpu_info().vmem_capacity_bytes)
    except Exception:
        return 64 * 1024 * 1024   # conservative fallback (v7x per-TC VMEM)


def _choose_tiling(M, H, x_isz, o_isz, w_isz, mxu_isz, budget,
                   single_buffer_consts, tm_max=512):
    """Pick a row tile tm: fits the VMEM budget (including in-kernel f32
    intermediates), uses a large row granule only when M is large, and aims
    for >=4 grid steps with an even count (v7x megacore split)."""
    w_bufs = 1 if single_buffer_consts else 2
    resident = w_bufs * H * H * w_isz + 4 * w_bufs * H * 4   # weight + params

    # Per-row working set: double-buffered x/out tiles, ~4 f32 (tm,H)
    # intermediates (dot result + GELU/LN temps), optional bf16 copy of x.
    per_row = 2 * H * (x_isz + o_isz) + 4 * H * 4 + H * mxu_isz
    tm_budget = (budget - resident) // max(per_row, 1)

    # Row granule: large when M is large (MXU-pass friendly, unmasked stores),
    # small for tiny M so padding stays bounded.
    granule = _MIN_ROW_TILE
    for g in (256, 128, 64, 32):
        if M >= 4 * g:
            granule = g
            break

    tm_budget = max(granule, min(tm_max, _round_down(int(tm_budget), granule)))
    m_rows = _round_up(M, granule)
    tm_budget = min(tm_budget, m_rows)

    max_steps = pl.cdiv(m_rows, granule)
    steps = pl.cdiv(m_rows, tm_budget)
    # >=4 steps for DMA/compute overlap when M permits; even count so the two
    # v7x TensorCores split the "parallel" grid evenly.
    target = max(steps, min(4, max_steps))
    if target > 1 and target % 2 == 1 and target < max_steps:
        target += 1
    tm = min(tm_budget, _round_up(pl.cdiv(m_rows, target), granule))
    return int(max(granule, tm))


def _build_call(tm, H, m_pad, out_dtype, kernel, vmem_limit, cost,
                single_buffer_consts):
    const_kwargs = {}
    if single_buffer_consts:
        # Constant-index operands: single buffer -> halves resident weight VMEM.
        const_kwargs = dict(pipeline_mode=pl.Buffered(1))
    return pl.pallas_call(
        kernel,
        out_shape=jax.ShapeDtypeStruct((m_pad, H), out_dtype),
        grid_spec=pltpu.PrefetchScalarGridSpec(
            num_scalar_prefetch=0,
            grid=(m_pad // tm,),
            in_specs=[
                pl.BlockSpec((tm, H), lambda i: (i, 0)),                 # x tile
                pl.BlockSpec((H, H), lambda i: (0, 0), **const_kwargs),  # weight
                pl.BlockSpec((1, H), lambda i: (0, 0), **const_kwargs),  # bias
                pl.BlockSpec((1, H), lambda i: (0, 0), **const_kwargs),  # gamma
                pl.BlockSpec((1, H), lambda i: (0, 0), **const_kwargs),  # beta
            ],
            out_specs=pl.BlockSpec((tm, H), lambda i: (i, 0)),
        ),
        compiler_params=pltpu.CompilerParams(
            dimension_semantics=("parallel",),   # v7x: both TCs split the grid
            vmem_limit_bytes=int(vmem_limit),
        ),
        cost_estimate=cost,
    )


# --------------------------------------------------------------------------- #
# Wrapper (forward of BertPredictionHeadTransform)
# --------------------------------------------------------------------------- #
def bert_prediction_head_transform(hidden_states, weight, bias, gamma, beta, *,
                                   eps=1e-12,
                                   tm=None,
                                   mxu_dtype=jnp.bfloat16,
                                   approximate_gelu=False,
                                   single_buffer_constants=True,
                                   vmem_budget_bytes=None,
                                   vmem_limit_bytes=None):
    """hidden_states: [..., H]; weight: [H, H] (PyTorch nn.Linear layout);
    bias/gamma/beta: [H]. Output dtype follows hidden_states' dtype (pass bf16
    activations to halve HBM traffic; no extra wrapper-side casts are added)."""
    orig_shape = hidden_states.shape
    H = orig_shape[-1]
    x2 = hidden_states.reshape(-1, H)
    M = x2.shape[0]

    # Weight pre-transposed so the kernel does a plain x @ W; cast once to the
    # MXU dtype (halves resident-weight VMEM and HBM). LN/bias params stay f32.
    w_t = weight.T
    if mxu_dtype is not None and w_t.dtype != mxu_dtype:
        w_t = w_t.astype(mxu_dtype)
    b2 = bias.reshape(1, H).astype(jnp.float32)
    g2 = gamma.reshape(1, H).astype(jnp.float32)
    be2 = beta.reshape(1, H).astype(jnp.float32)

    x_isz = x2.dtype.itemsize
    w_isz = w_t.dtype.itemsize
    o_isz = x2.dtype.itemsize
    mxu_isz = 0
    if mxu_dtype is not None and x2.dtype != jnp.dtype(mxu_dtype):
        mxu_isz = jnp.dtype(mxu_dtype).itemsize

    # Generation-aware VMEM sizing: ~80% of physical VMEM as the scoped limit
    # (128 MiB parts -> ~102 MiB; v7x 64 MiB/TC -> ~51 MiB), ~75% of the limit
    # as the tile-chooser budget (intermediates are modelled explicitly).
    capacity = _vmem_capacity_bytes()
    if vmem_limit_bytes is None:
        vmem_limit_bytes = int(capacity * 0.8)
    if vmem_budget_bytes is None:
        vmem_budget_bytes = int(vmem_limit_bytes * 0.75)

    if tm is None:
        tm = _choose_tiling(M, H, x_isz, o_isz, w_isz, mxu_isz,
                            vmem_budget_bytes, single_buffer_constants)
    tm = max(_MIN_ROW_TILE, _round_down(int(tm), _MIN_ROW_TILE))

    m_pad = pl.cdiv(M, tm) * tm
    if m_pad != M:
        # TODO(synk): for large non-divisible M, run the remainder rows through
        # a second small pallas_call instead of this extra HBM pad copy.
        x2 = jnp.pad(x2, ((0, m_pad - M), (0, 0)))

    kernel = functools.partial(
        _head_transform_kernel, eps=float(eps), mxu_dtype=mxu_dtype,
        approximate_gelu=approximate_gelu, hidden=float(H))

    cost = pl.CostEstimate(
        flops=2 * m_pad * H * H + 10 * m_pad * H,
        transcendentals=m_pad * H,
        bytes_accessed=(m_pad * H * x_isz + H * H * w_isz
                        + 3 * H * 4 + m_pad * H * o_isz))

    def run(single_buf):
        call = _build_call(tm, H, m_pad, x2.dtype, kernel,
                           vmem_limit_bytes, cost, single_buf)
        return call(x2, w_t, b2, g2, be2)

    if single_buffer_constants:
        try:
            out = run(True)
        except Exception:
            # Fallback: default double-buffered constants (always supported).
            out = run(False)
    else:
        out = run(False)

    if m_pad != M:
        out = out[:M]
    return out.reshape(orig_shape)


# --------------------------------------------------------------------------- #
# References
# --------------------------------------------------------------------------- #
def _gelu_exact(h):
    return 0.5 * h * (1.0 + lax.erf(h * (1.0 / math.sqrt(2.0))))


def _gelu_tanh(h):
    c = math.sqrt(2.0 / math.pi)
    return 0.5 * h * (1.0 + jnp.tanh(c * (h + 0.044715 * h * h * h)))


def _layernorm(h, gamma, beta, eps):
    mean = jnp.mean(h, axis=-1, keepdims=True)
    var = jnp.mean((h - mean) ** 2, axis=-1, keepdims=True)
    return (h - mean) * lax.rsqrt(var + eps) * gamma + beta


def _reference(x, weight, bias, gamma, beta, eps, *, mxu_dtype=None,
               approximate=False):
    if mxu_dtype is None:
        h = x.astype(jnp.float32) @ weight.T.astype(jnp.float32) + bias
    else:
        h = jnp.dot(x.astype(mxu_dtype), weight.T.astype(mxu_dtype),
                    preferred_element_type=jnp.float32) + bias
    h = _gelu_tanh(h) if approximate else _gelu_exact(h)
    return _layernorm(h, gamma, beta, eps)


# --------------------------------------------------------------------------- #
# Demo / self-test
# --------------------------------------------------------------------------- #
if __name__ == "__main__":
    key = jax.random.PRNGKey(0)
    batch, seq, hidden = 2, 9, 32        # seq=9 -> 18 tokens, exercises padding
    eps = 1e-12

    k1, k2, k3, k4, k5 = jax.random.split(key, 5)
    x = jax.random.normal(k1, (batch, seq, hidden), dtype=jnp.float32)
    weight = jax.random.normal(k2, (hidden, hidden), dtype=jnp.float32) * 0.05
    bias = jax.random.normal(k3, (hidden,), dtype=jnp.float32) * 0.05
    gamma = 1.0 + 0.1 * jax.random.normal(k4, (hidden,), dtype=jnp.float32)
    beta = 0.1 * jax.random.normal(k5, (hidden,), dtype=jnp.float32)
    x2d = x.reshape(-1, hidden)

    # 1) Default path (bf16 MXU, exact erf GELU) vs a reference with the same
    #    bf16 operand quantization -> tight tolerance.
    out = bert_prediction_head_transform(x, weight, bias, gamma, beta, eps=eps)
    jax.block_until_ready(out)
    ref_q = _reference(x2d, weight, bias, gamma, beta, eps,
                       mxu_dtype=jnp.bfloat16).reshape(x.shape)
    assert jnp.allclose(out, ref_q, atol=1e-4, rtol=1e-4), \
        "mismatch vs bf16-MXU erf reference"

    # 2) Strict-parity path (f32 MXU) vs exact f32 module semantics.
    out_f32 = bert_prediction_head_transform(
        x, weight, bias, gamma, beta, eps=eps, mxu_dtype=None)
    jax.block_until_ready(out_f32)
    ref_f32 = _reference(x2d, weight, bias, gamma, beta, eps,
                         mxu_dtype=None).reshape(x.shape)
    assert jnp.allclose(out_f32, ref_f32, atol=1e-5, rtol=1e-5), \
        "mismatch vs exact f32 reference"

    # 3) tanh-approx GELU fast path vs a tanh reference (same quantization).
    out_tanh = bert_prediction_head_transform(
        x, weight, bias, gamma, beta, eps=eps, approximate_gelu=True)
    jax.block_until_ready(out_tanh)
    ref_tanh = _reference(x2d, weight, bias, gamma, beta, eps,
                          mxu_dtype=jnp.bfloat16,
                          approximate=True).reshape(x.shape)
    assert jnp.allclose(out_tanh, ref_tanh, atol=1e-4, rtol=1e-4), \
        "mismatch vs bf16-MXU tanh reference"

    # Loose sanity: bf16 path stays close to f32 module semantics.
    assert jnp.allclose(out, ref_f32, atol=1e-1, rtol=1e-1), \
        "bf16 MXU path drifted too far from f32 semantics"

    print("KERNEL_OK")
</pallas_src>

<mosaic_0001>
module attributes {stable_mosaic.version = 11 : i64} {
  func.func @_head_transform_kernel(%arg0: i32, %arg1: memref<16x32xf32, #tpu.memory_space<vmem>>, %arg2: memref<32x32xbf16, #tpu.memory_space<vmem>>, %arg3: memref<1x32xf32, #tpu.memory_space<vmem>>, %arg4: memref<1x32xf32, #tpu.memory_space<vmem>>, %arg5: memref<1x32xf32, #tpu.memory_space<vmem>>, %arg6: memref<16x32xf32, #tpu.memory_space<vmem>>) attributes {dimension_semantics = [#tpu.dimension_semantics<parallel>], iteration_bounds = array<i64: 2>, scalar_prefetch = 0 : i64, scratch_operands = 0 : i64, tpu.core_type = #tpu.core_type<tc>, window_params = [{transform_indices = @transform_0, window_bounds = array<i64: 16, 32>}, {pipeline_mode = #tpu.pipeline_mode<synchronous>, transform_indices = @transform_1, window_bounds = array<i64: 32, 32>}, {pipeline_mode = #tpu.pipeline_mode<synchronous>, transform_indices = @transform_2, window_bounds = array<i64: 1, 32>}, {pipeline_mode = #tpu.pipeline_mode<synchronous>, transform_indices = @transform_3, window_bounds = array<i64: 1, 32>}, {pipeline_mode = #tpu.pipeline_mode<synchronous>, transform_indices = @transform_4, window_bounds = array<i64: 1, 32>}, {transform_indices = @transform_5, window_bounds = array<i64: 16, 32>}]} {
    %c0 = arith.constant 0 : index
    %c0_0 = arith.constant 0 : index
    %0 = vector.load %arg1[%c0, %c0_0] : memref<16x32xf32, #tpu.memory_space<vmem>>, vector<16x32xf32>
    %1 = arith.truncf %0 : vector<16x32xf32> to vector<16x32xbf16>
    %c0_1 = arith.constant 0 : index
    %c0_2 = arith.constant 0 : index
    %2 = vector.load %arg2[%c0_1, %c0_2] : memref<32x32xbf16, #tpu.memory_space<vmem>>, vector<32x32xbf16>
    %cst = arith.constant dense<0.000000e+00> : vector<16x32xf32>
    %3 = tpu.matmul %1, %2, %cst {dimension_numbers = #tpu.dot_dimension_numbers<[1], [0], [0], [1], [0, 0, 1, 1], [], []>} : vector<16x32xbf16>, vector<32x32xbf16>, vector<16x32xf32> -> vector<16x32xf32>
    %c0_3 = arith.constant 0 : index
    %c0_4 = arith.constant 0 : index
    %4 = vector.load %arg3[%c0_3, %c0_4] : memref<1x32xf32, #tpu.memory_space<vmem>>, vector<1x32xf32>
    %5 = vector.broadcast %4 : vector<1x32xf32> to vector<16x32xf32>
    %6 = arith.addf %3, %5 : vector<16x32xf32>
    %cst_5 = arith.constant 5.000000e-01 : f32
    %7 = vector.broadcast %cst_5 : f32 to vector<16x32xf32>
    %8 = arith.mulf %7, %6 : vector<16x32xf32>
    %cst_6 = arith.constant 0.707106769 : f32
    %9 = vector.broadcast %cst_6 : f32 to vector<16x32xf32>
    %10 = arith.mulf %6, %9 : vector<16x32xf32>
    %11 = math.erf %10 : vector<16x32xf32>
    %cst_7 = arith.constant 1.000000e+00 : f32
    %12 = vector.broadcast %cst_7 : f32 to vector<16x32xf32>
    %13 = arith.addf %12, %11 : vector<16x32xf32>
    %14 = arith.mulf %8, %13 : vector<16x32xf32>
    %cst_8 = arith.constant dense<0.000000e+00> : vector<16xf32>
    %15 = vector.multi_reduction <add>, %14, %cst_8 [1] : vector<16x32xf32> to vector<16xf32>
    %16 = vector.shape_cast %15 : vector<16xf32> to vector<16x1xf32>
    %17 = arith.mulf %14, %14 : vector<16x32xf32>
    %cst_9 = arith.constant dense<0.000000e+00> : vector<16xf32>
    %18 = vector.multi_reduction <add>, %17, %cst_9 [1] : vector<16x32xf32> to vector<16xf32>
    %19 = vector.shape_cast %18 : vector<16xf32> to vector<16x1xf32>
    %cst_10 = arith.constant 3.125000e-02 : f32
    %20 = vector.broadcast %cst_10 : f32 to vector<16x1xf32>
    %21 = arith.mulf %16, %20 : vector<16x1xf32>
    %cst_11 = arith.constant 3.125000e-02 : f32
    %22 = vector.broadcast %cst_11 : f32 to vector<16x1xf32>
    %23 = arith.mulf %19, %22 : vector<16x1xf32>
    %24 = arith.mulf %21, %21 : vector<16x1xf32>
    %25 = arith.subf %23, %24 : vector<16x1xf32>
    %cst_12 = arith.constant 0.000000e+00 : f32
    %26 = vector.broadcast %cst_12 : f32 to vector<16x1xf32>
    %27 = arith.maximumf %25, %26 : vector<16x1xf32>
    %cst_13 = arith.constant 9.99999996E-13 : f32
    %28 = vector.broadcast %cst_13 : f32 to vector<16x1xf32>
    %29 = arith.addf %27, %28 : vector<16x1xf32>
    %30 = math.rsqrt %29 : vector<16x1xf32>
    %31 = vector.broadcast %21 : vector<16x1xf32> to vector<16x32xf32>
    %32 = arith.subf %14, %31 : vector<16x32xf32>
    %33 = vector.broadcast %30 : vector<16x1xf32> to vector<16x32xf32>
    %34 = arith.mulf %32, %33 : vector<16x32xf32>
    %c0_14 = arith.constant 0 : index
    %c0_15 = arith.constant 0 : index
    %35 = vector.load %arg4[%c0_14, %c0_15] : memref<1x32xf32, #tpu.memory_space<vmem>>, vector<1x32xf32>
    %36 = vector.broadcast %35 : vector<1x32xf32> to vector<16x32xf32>
    %37 = arith.mulf %34, %36 : vector<16x32xf32>
    %c0_16 = arith.constant 0 : index
    %c0_17 = arith.constant 0 : index
    %38 = vector.load %arg5[%c0_16, %c0_17] : memref<1x32xf32, #tpu.memory_space<vmem>>, vector<1x32xf32>
    %39 = vector.broadcast %38 : vector<1x32xf32> to vector<16x32xf32>
    %40 = arith.addf %37, %39 : vector<16x32xf32>
    %c0_18 = arith.constant 0 : index
    %c0_19 = arith.constant 0 : index
    %41 = vector.load %arg6[%c0_18, %c0_19] : memref<16x32xf32, #tpu.memory_space<vmem>>, vector<16x32xf32>
    tpu.vector_store %arg6[%c0_18, %c0_19], %40 {strides = array<i32>} : memref<16x32xf32, #tpu.memory_space<vmem>>, vector<16x32xf32>,
    return
  }
  func.func @transform_0(%arg0: i32) -> (i32, i32) {
    %c0_i32 = arith.constant 0 : i32
    %c0_i32_0 = arith.constant 0 : i32
    return %arg0, %c0_i32 : i32, i32
  }
  func.func @transform_1(%arg0: i32) -> (i32, i32) {
    %c0_i32 = arith.constant 0 : i32
    %c0_i32_0 = arith.constant 0 : i32
    %c0_i32_1 = arith.constant 0 : i32
    return %c0_i32, %c0_i32_0 : i32, i32
  }
  func.func @transform_2(%arg0: i32) -> (i32, i32) {
    %c0_i32 = arith.constant 0 : i32
    %c0_i32_0 = arith.constant 0 : i32
    %c0_i32_1 = arith.constant 0 : i32
    return %c0_i32, %c0_i32_0 : i32, i32
  }
  func.func @transform_3(%arg0: i32) -> (i32, i32) {
    %c0_i32 = arith.constant 0 : i32
    %c0_i32_0 = arith.constant 0 : i32
    %c0_i32_1 = arith.constant 0 : i32
    return %c0_i32, %c0_i32_0 : i32, i32
  }
  func.func @transform_4(%arg0: i32) -> (i32, i32) {
    %c0_i32 = arith.constant 0 : i32
    %c0_i32_0 = arith.constant 0 : i32
    %c0_i32_1 = arith.constant 0 : i32
    return %c0_i32, %c0_i32_0 : i32, i32
  }
  func.func @transform_5(%arg0: i32) -> (i32, i32) {
    %c0_i32 = arith.constant 0 : i32
    %c0_i32_0 = arith.constant 0 : i32
    return %arg0, %c0_i32 : i32, i32
  }
}

module attributes {stable_mosaic.version = 11 : i64} {
  func.func @_head_transform_kernel(%arg0: i32, %arg1: memref<16x32xf32, #tpu.memory_space<vmem>>, %arg2: memref<32x32xbf16, #tpu.memory_space<vmem>>, %arg3: memref<1x32xf32, #tpu.memory_space<vmem>>, %arg4: memref<1x32xf32, #tpu.memory_space<vmem>>, %arg5: memref<1x32xf32, #tpu.memory_space<vmem>>, %arg6: memref<16x32xf32, #tpu.memory_space<vmem>>) attributes {dimension_semantics = [#tpu.dimension_semantics<parallel>], iteration_bounds = array<i64: 2>, scalar_prefetch = 0 : i64, scratch_operands = 0 : i64, tpu.core_type = #tpu.core_type<tc>, window_params = [{transform_indices = @transform_0, window_bounds = array<i64: 16, 32>}, {pipeline_mode = #tpu.pipeline_mode<synchronous>, transform_indices = @transform_1, window_bounds = array<i64: 32, 32>}, {pipeline_mode = #tpu.pipeline_mode<synchronous>, transform_indices = @transform_2, window_bounds = array<i64: 1, 32>}, {pipeline_mode = #tpu.pipeline_mode<synchronous>, transform_indices = @transform_3, window_bounds = array<i64: 1, 32>}, {pipeline_mode = #tpu.pipeline_mode<synchronous>, transform_indices = @transform_4, window_bounds = array<i64: 1, 32>}, {transform_indices = @transform_5, window_bounds = array<i64: 16, 32>}]} {
    %c0 = arith.constant 0 : index
    %c0_0 = arith.constant 0 : index
    %0 = vector.load %arg1[%c0, %c0_0] : memref<16x32xf32, #tpu.memory_space<vmem>>, vector<16x32xf32>
    %1 = arith.truncf %0 : vector<16x32xf32> to vector<16x32xbf16>
    %c0_1 = arith.constant 0 : index
    %c0_2 = arith.constant 0 : index
    %2 = vector.load %arg2[%c0_1, %c0_2] : memref<32x32xbf16, #tpu.memory_space<vmem>>, vector<32x32xbf16>
    %cst = arith.constant dense<0.000000e+00> : vector<16x32xf32>
    %3 = tpu.matmul %1, %2, %cst {dimension_numbers = #tpu.dot_dimension_numbers<[1], [0], [0], [1], [0, 0, 1, 1], [], []>} : vector<16x32xbf16>, vector<32x32xbf16>, vector<16x32xf32> -> vector<16x32xf32>
    %c0_3 = arith.constant 0 : index
    %c0_4 = arith.constant 0 : index
    %4 = vector.load %arg3[%c0_3, %c0_4] : memref<1x32xf32, #tpu.memory_space<vmem>>, vector<1x32xf32>
    %5 = vector.broadcast %4 : vector<1x32xf32> to vector<16x32xf32>
    %6 = arith.addf %3, %5 : vector<16x32xf32>
    %cst_5 = arith.constant 5.000000e-01 : f32
    %7 = vector.broadcast %cst_5 : f32 to vector<16x32xf32>
    %8 = arith.mulf %7, %6 : vector<16x32xf32>
    %cst_6 = arith.constant 0.707106769 : f32
    %9 = vector.broadcast %cst_6 : f32 to vector<16x32xf32>
    %10 = arith.mulf %6, %9 : vector<16x32xf32>
    %11 = math.erf %10 : vector<16x32xf32>
    %cst_7 = arith.constant 1.000000e+00 : f32
    %12 = vector.broadcast %cst_7 : f32 to vector<16x32xf32>
    %13 = arith.addf %12, %11 : vector<16x32xf32>
    %14 = arith.mulf %8, %13 : vector<16x32xf32>
    %cst_8 = arith.constant dense<0.000000e+00> : vector<16xf32>
    %15 = vector.multi_reduction <add>, %14, %cst_8 [1] : vector<16x32xf32> to vector<16xf32>
    %16 = vector.shape_cast %15 : vector<16xf32> to vector<16x1xf32>
    %17 = arith.mulf %14, %14 : vector<16x32xf32>
    %cst_9 = arith.constant dense<0.000000e+00> : vector<16xf32>
    %18 = vector.multi_reduction <add>, %17, %cst_9 [1] : vector<16x32xf32> to vector<16xf32>
    %19 = vector.shape_cast %18 : vector<16xf32> to vector<16x1xf32>
    %cst_10 = arith.constant 3.125000e-02 : f32
    %20 = vector.broadcast %cst_10 : f32 to vector<16x1xf32>
    %21 = arith.mulf %16, %20 : vector<16x1xf32>
    %cst_11 = arith.constant 3.125000e-02 : f32
    %22 = vector.broadcast %cst_11 : f32 to vector<16x1xf32>
    %23 = arith.mulf %19, %22 : vector<16x1xf32>
    %24 = arith.mulf %21, %21 : vector<16x1xf32>
    %25 = arith.subf %23, %24 : vector<16x1xf32>
    %cst_12 = arith.constant 0.000000e+00 : f32
    %26 = vector.broadcast %cst_12 : f32 to vector<16x1xf32>
    %27 = arith.maximumf %25, %26 : vector<16x1xf32>
    %cst_13 = arith.constant 9.99999996E-13 : f32
    %28 = vector.broadcast %cst_13 : f32 to vector<16x1xf32>
    %29 = arith.addf %27, %28 : vector<16x1xf32>
    %30 = math.rsqrt %29 : vector<16x1xf32>
    %31 = vector.broadcast %21 : vector<16x1xf32> to vector<16x32xf32>
    %32 = arith.subf %14, %31 : vector<16x32xf32>
    %33 = vector.broadcast %30 : vector<16x1xf32> to vector<16x32xf32>
    %34 = arith.mulf %32, %33 : vector<16x32xf32>
    %c0_14 = arith.constant 0 : index
    %c0_15 = arith.constant 0 : index
    %35 = vector.load %arg4[%c0_14, %c0_15] : memref<1x32xf32, #tpu.memory_space<vmem>>, vector<1x32xf32>
    %36 = vector.broadcast %35 : vector<1x32xf32> to vector<16x32xf32>
    %37 = arith.mulf %34, %36 : vector<16x32xf32>
    %c0_16 = arith.constant 0 : index
    %c0_17 = arith.constant 0 : index
    %38 = vector.load %arg5[%c0_16, %c0_17] : memref<1x32xf32, #tpu.memory_space<vmem>>, vector<1x32xf32>
    %39 = vector.broadcast %38 : vector<1x32xf32> to vector<16x32xf32>
    %40 = arith.addf %37, %39 : vector<16x32xf32>
    %c0_18 = arith.constant 0 : index
    %c0_19 = arith.constant 0 : index
    %41 = vector.load %arg6[%c0_18, %c0_19] : memref<16x32xf32, #tpu.memory_space<vmem>>, vector<16x32xf32>
    tpu.vector_store %arg6[%c0_18, %c0_19], %40 {strides = array<i32>} : memref<16x32xf32, #tpu.memory_space<vmem>>, vector<16x32xf32>,
    return
  }
  func.func @transform_0(%arg0: i32) -> (i32, i32) {
    %c0_i32 = arith.constant 0 : i32
    %c0_i32_0 = arith.constant 0 : i32
    return %arg0, %c0_i32 : i32, i32
  }
  func.func @transform_1(%arg0: i32) -> (i32, i32) {
    %c0_i32 = arith.constant 0 : i32
    %c0_i32_0 = arith.constant 0 : i32
    %c0_i32_1 = arith.constant 0 : i32
    return %c0_i32, %c0_i32_0 : i32, i32
  }
  func.func @transform_2(%arg0: i32) -> (i32, i32) {
    %c0_i32 = arith.constant 0 : i32
    %c0_i32_0 = arith.constant 0 : i32
    %c0_i32_1 = arith.constant 0 : i32
    return %c0_i32, %c0_i32_0 : i32, i32
  }
  func.func @transform_3(%arg0: i32) -> (i32, i32) {
    %c0_i32 = arith.constant 0 : i32
    %c0_i32_0 = arith.constant 0 : i32
    %c0_i32_1 = arith.constant 0 : i32
    return %c0_i32, %c0_i32_0 : i32, i32
  }
  func.func @transform_4(%arg0: i32) -> (i32, i32) {
    %c0_i32 = arith.constant 0 : i32
    %c0_i32_0 = arith.constant 0 : i32
    %c0_i32_1 = arith.constant 0 : i32
    return %c0_i32, %c0_i32_0 : i32, i32
  }
  func.func @transform_5(%arg0: i32) -> (i32, i32) {
    %c0_i32 = arith.constant 0 : i32
    %c0_i32_0 = arith.constant 0 : i32
    return %arg0, %c0_i32 : i32, i32
  }
}

</mosaic_0001>

<bundles_post_ra>
// kernel: tpu_custom_call.1
= control target key start
LH: loop header
LB: loop body
LE: loop exit
PB: predicated region body
PF: predicated region fallthrough
CT: control target
= control target key end

     0   :  { %10 = vsyncpa [#allocation3], 0  ;;  %s1004_s0 = inlined_call_operand.hbm [shape: f32[32,32], index: 0, kind: input, shape index: {}]   ;;  %s1005_s1 = inlined_call_operand.hbm [shape: bf16[32,32], index: 1, kind: input, shape index: {}]   ;;  %s1006_s2 = inlined_call_operand.vmem [shape: f32[1,32], index: 2, kind: input, shape index: {}]   ;;  %s1007_s3 = inlined_call_operand.vmem [shape: f32[1,32], index: 3, kind: input, shape index: {}]   ;;  %s1008_s4 = inlined_call_operand.vmem [shape: f32[1,32], index: 4, kind: input, shape index: {}]   ;;  %s1009_s5 = inlined_call_operand.hbm [shape: f32[32,32], index: 5, kind: output, shape index: {}]  }
   0x1   :  { %12 = vsyncpa [#allocation3 + $0x1], 0 }
   0x2   :  { %13 = vsyncpa [#allocation6], 0 }
   0x3   :  { %14 = vsyncpa [#allocation4], 0 }
   0x4   :  { %16 = vsyncpa [#allocation4 + $0x1], 0  ;;  %s831_s18 = smov 0   ;;  %s833_s19 = smov 0  }
   0x5   :  { %s835_s20 = smov 0   ;;  %s837_s21 = smov 0  }
   0x6 LB: > { %s852_s22 = sadd.s32 4294967295, %s792_s21   ;;  %s557_s23 = sadd.s32 4294967294, %s792_s21   ;;  %s792_s21 = sphi %s837_s21, %s1019_s21   ;;  %s788_s20 = sphi %s835_s20, %s1018_s20   ;;  %s784_s19 = sphi %s833_s19, %s1017_s19   ;;  %s780_s18 = sphi %s831_s18, %s1016_s18  }
   0x7   : > { %p42_p0 = scmp.ne.s32.totalorder %s784_s19, %s780_s18  ;;  %p43_p1 = scmp.eq.s32.totalorder %s852_s22, 0 }
   0x8   : > { %p150_p2 = scmp.eq.s32.totalorder %s852_s22, 1  ;;  %p156_p3 = scmp.eq.s32.totalorder %s557_s23, 1 }
   0x9   : > { %p861_p4 = por %p43_p1, %p42_p0  ;;  %p558_p5 = scmp.ge.s32.totalorder %s792_s21, 1 }
   0xa   : > { %p866_p6 = por %p156_p3, %p42_p0  ;;  %p163_p7 = scmp.lt.s32.totalorder %s792_s21, 3 }
   0xb   : > { %s174_s28 = sshll.u32 %s1005_s1, 4  ;;  %s794_s30 = smov [#allocation5]   ;;  %s175_s28 = int_to_ptr.hbm [resolvable:$true] %s174_s28 }
   0xc   : > { %p874_p8 = pnand %p558_p5, %p163_p7  ;;  %s176_s6 = sshll.u32 %s794_s30, 4  ;;  %s177_s6 = int_to_ptr.vmem [resolvable:$true] %s176_s6 }
   0xd   : > { %s884_s7 = sadd.s32 1, %s792_s21   ;;  %s795_s8 = smov 64  }
   0xe   : > { %p596_p9 = pneg %p874_p8  ;;  %s796_s9 = smov 4  }
   0xf   : > { %s26_s10 = ssub.s32 %s792_s21, %s884_s7  ;;  %s29_s11 = sadd.s32 1, %s788_s20 }
  0x10   : > { %p597_p10 = pnand %p596_p9, %p43_p1  ;;  %p27_p12 = scmp.eq.s32.totalorder %s26_s10, 0 }
  0x11   : > { %p36_p13 = scmp.ne.s32.totalorder %s788_s20, %s784_s19  ;;  %p37_p0 = scmp.eq.s32.totalorder %s792_s21, 0 }
  0x12   : > { %599 = dma.hbm_to_vmem [thread:$0]  (!%p597_p10), %s175_s28, 256, %s177_s6, [#allocation6], %s795_s8, %s795_s8, %s796_s9  }
  0x13   : > { %p609_p3 = scmp.lt.s32.totalorder %s792_s21, 2  ;;  %p38_p5 = por %p37_p0, %p36_p13 }
  0x14   : > { %s894_s12 = scalar_select %p27_p12, %s788_s20, %s29_s11  }
  0x15   : > { %p898_p7 = por %p150_p2, %p36_p13  ;;  %s199_s14 = sand.u32 1, %s788_s20  }
  0x16   : > { %s584_s15 = sshll.u32 %s792_s21, 4  ;;  %s561_s16 = sshll.u32 %s199_s14, 4 }
  0x17   : > { %s208_s26 = scalar_lea.hbm %s1004_s0, %s584_s15  ;;  %s203_s28 = scalar_lea.vmem [#allocation2], %s561_s16 }
  0x18   : > { %s209_s27 = sshll.u32 %s208_s26, 4  ;;  %s211_s30 = sshll.u32 %s203_s28, 4  ;;  %s210_s27 = int_to_ptr.hbm [resolvable:$true] %s209_s27  ;;  %s212_s30 = int_to_ptr.vmem [resolvable:$true] %s211_s30 }
  0x19   : > { %p909_p9 = pnand %p609_p3, %p38_p5  ;;  %s200_s8 = scalar_lea.sflag [#allocation3], %s199_s14 }
  0x1a   : > { %s692_s9 = sshra.s32 %s210_s27, 4  ;;  %s699_s16 = scalar_lea.hbm %s1004_s0, 32  ;;  %s693_s9 = int_to_ptr.hbm [resolvable:$true] %s692_s9 }
  0x1b   : > { %s694_s10 = scalar_lea.hbm %s693_s9, 16  ;;  %p696_p10 = pneg %p909_p9 }
  0x1c   : > { %p695_p2 = scmp.ne.s32.totalorder %s693_s9, %s694_s10  ;;  %p700_p0 = scmp.lt.s32.totalorder %s693_s9, %s1004_s0 }
  0x1d   : > { %p701_p3 = scmp.lt.s32.totalorder %s699_s16, %s694_s10 }
  0x1e   : > { %p697_p12 = pnand %p696_p10, %p695_p2 }
  0x1f   : > { %p702_p5 = por %p701_p3, %p700_p0 }
  0x20   : > { %p698_p13 = pneg %p697_p12 }
  0x22   : > { %p703_p11 = pnand %p702_p5, %p698_p13 }
  0x24   : > { %706 = shalt.err (!%p703_p11)
}
  0x25   : > { %s797_s14 = smov 128   ;;  %s798_s26 = smov 8  }
  0x26   : > { %603 = dma.hbm_to_vmem [thread:$0]  (!%p909_p9), %s210_s27, 256, %s212_s30, %s200_s8, %s797_s14, %s797_s14, %s798_s26  }
  0x27   : > { %223 = sbr.rel (%p874_p8) target bundleno = 397 (0x18d), region = 40  ;;  %s926_s28 = sand.u32 (!%p874_p8), 1, %s784_s19  }
  0x28   : > { %s565_s9 = sshll.u32 (!%p874_p8), %s926_s28, 4  ;;  %s226_s10 = scalar_lea.sflag (!%p874_p8), [#allocation3], %s926_s28 }
  0x29   : > { %s229_s11 = scalar_lea.vmem (!%p874_p8), [#allocation2], %s565_s9 }
  0x2c   : > { %767 = dma.done.wait (%p861_p4), %s226_s10, 256  }
  0x2d   : > { %769 = vsyncadd (%p861_p4), %s226_s10, 4294967040 }
  0x2e   : > { %771 = dma.done.wait (%p43_p1), [#allocation6], 256  }
  0x2f   : > { %773 = vsyncadd (%p43_p1), [#allocation6], 4294967040  ;;  %v586_v0 = vld [vmem:[#allocation5 + $0x8] sm:$0xff]  ;;  %v585_v1 = vld [vmem:[#allocation5] sm:$0xff]  ;;  %vm288_vm0 = vcmask 261120   ;;  %s587_s15 = sshll.u32 %s852_s22, 4 }
  0x30   : > { %v265_v2 = vld [vmem:[%s229_s11] sm:$0xff]  ;;  %298 = vmatpush.bf16.msra.mxu0 %v586_v0  ;;  %v266_v3 = vld [vmem:[%s229_s11 + $0x8] sm:$0xff]  ;;  %s261_s16 = scalar_lea.vmem [#allocation7], %s565_s9  ;;  %s470_s14 = scalar_lea.hbm %s1009_s5, %s587_s15 }
  0x31   : > { %v267_v4 = vpack.c.bf16 %v266_v3, %v265_v2  ;;  %v651_v5 = vld [vmem:[%s1006_s2] ss:$0 sm:$0xff]  ;;  %s471_s22 = sshll.u32 %s261_s16, 4  ;;  %s473_s26 = sshll.u32 %s470_s14, 4  ;;  %s472_s22 = int_to_ptr.vmem [resolvable:$true] %s471_s22  ;;  %s474_s26 = int_to_ptr.hbm [resolvable:$true] %s473_s26 }
  0x32   : > { %s459_s9 = scalar_lea.sflag [#allocation4], %s926_s28  ;;  %s736_s10 = sshra.s32 %s474_s26, 4  ;;  %s737_s10 = int_to_ptr.hbm [resolvable:$true] %s736_s10 }
  0x33   : > { %s738_s11 = scalar_lea.hbm %s737_s10, 16  ;;  %s742_s24 = scalar_lea.hbm %s1009_s5, 32 }
  0x34   : > { %299 = vmatpush.bf16.msra.mxu0 %v585_v1  ;;  %p739_p1 = scmp.ne.s32.totalorder %s737_s10, %s738_s11  ;;  %p743_p11 = scmp.lt.s32.totalorder %s737_s10, %s1009_s5 }
  0x35   : > { %p744_p9 = scmp.lt.s32.totalorder %s742_s24, %s738_s11 }
  0x36   : > { %p740_p4 = pnand %p739_p1, %p898_p7 }
  0x37   : > { %576 = vmatmul.msk.bf16.vlgmr.msra.gmra.mxu0 %vm288_vm0, %v267_v4  ;;  %p745_p2 = por %p744_p9, %p743_p11 }
  0x38   : > { %p741_p8 = pneg %p740_p4 }
  0x3a   : > { %p746_p10 = pnand %p745_p2, %p741_p8 }
  0xb4   : > { %v301_v6 = vpop.f32.mrf.mxu0 }
  0xb5   : > { %v944_v7 = vadd.f32 %v651_v5, %v301_v6 }
  0xb7   : > { %v308_v8 = vmul.f32 0.70710677, %v944_v7 }
  0xb9   : > { %v310_v9 = vmul.f32 %v308_v8, %v308_v8 }
  0xbb   : > { %v311_v10 = vmin.f32 %v310_v9, 16.0 }
  0xbc   : > { %v303_v11 = vpop.f32.mrf.mxu0 }
  0xbd   : > { %v312_v12 = vmul.f32 2.1237322e-06, %v311_v10  ;;  %v323_v13 = vmul.f32 3.8918573e-05, %v311_v10  ;;  %v947_v14 = vadd.f32 %v651_v5, %v303_v11 }
  0xbf   : > { %v313_v15 = vadd.f32 0.00028619796, %v312_v12  ;;  %v324_v16 = vadd.f32 0.001143296, %v323_v13  ;;  %v950_v17 = vmul.f32 0.70710677, %v947_v14 }
  0xc0   : > { %v306_v13 = vmul.f32 0.5, %v944_v7  ;;  %v307_v7 = vmul.f32 0.5, %v947_v14 }
  0xc1   : > { %v314_v18 = vmul.f32 %v313_v15, %v311_v10  ;;  %v325_v19 = vmul.f32 %v324_v16, %v311_v10  ;;  %v350_v20 = vmul.f32 %v950_v17, %v950_v17 }
  0xc3   : > { %v326_v21 = vadd.f32 0.014752088, %v325_v19  ;;  %v315_v22 = vadd.f32 0.0036580483, %v314_v18  ;;  %v351_v23 = vmin.f32 %v350_v20, 16.0 }
  0xc5   : > { %v327_v24 = vmul.f32 %v326_v21, %v311_v10  ;;  %v352_v25 = vmul.f32 2.1237322e-06, %v351_v23  ;;  %v363_v26 = vmul.f32 3.8918573e-05, %v351_v23  ;;  %v316_v28 = vmul.f32 %v315_v22, %v311_v10 }
  0xc7   : > { %v328_v27 = vadd.f32 0.112945676, %v327_v24  ;;  %v353_v29 = vadd.f32 0.00028619796, %v352_v25  ;;  %v364_v30 = vadd.f32 0.001143296, %v363_v26 }
  0xc8   : > { %v317_v35 = vadd.f32 0.05243302, %v316_v28 }
  0xc9   : > { %v329_v31 = vmul.f32 %v328_v27, %v311_v10  ;;  %v354_v32 = vmul.f32 %v353_v29, %v351_v23  ;;  %v365_v33 = vmul.f32 %v364_v30, %v351_v23 }
  0xca   : > { %v318_v41 = vmul.f32 %v317_v35, %v311_v10 }
  0xcb   : > { %v330_v34 = vadd.f32 0.4994258, %v329_v31  ;;  %v366_v36 = vadd.f32 0.014752088, %v365_v33  ;;  %v355_v38 = vadd.f32 0.0036580483, %v354_v32 }
  0xcc   : > { %v319_v45 = vadd.f32 0.18741608, %v318_v41 }
  0xcd   : > { %v331_v37 = vmul.f32 %v330_v34, %v311_v10  ;;  %v367_v39 = vmul.f32 %v366_v36, %v351_v23  ;;  %v356_v43 = vmul.f32 %v355_v38, %v351_v23 }
  0xce   : > { %v320_v50 = vmul.f32 %v319_v45, %v311_v10 }
  0xcf   : > { %v332_v40 = vadd.f32 1.0, %v331_v37  ;;  %v368_v42 = vadd.f32 0.112945676, %v367_v39  ;;  %v357_v47 = vadd.f32 0.05243302, %v356_v43 }
  0xd0   : > { %v321_v56 = vadd.f32 1.1283791, %v320_v50 }
  0xd1   : > { %654 = vrcp.f32 %v332_v40  ;;  %v369_v44 = vmul.f32 %v368_v42, %v351_v23  ;;  %v358_v53 = vmul.f32 %v357_v47, %v351_v23  ;;  %v344_v55 = vand.u32 2147483648, %v332_v40 }
  0xd2   : > { %v342_v58 = vand.u32 2147483647, %v332_v40  ;;  %vm338_vm2 = vweird.f32 %v332_v40  ;;  %v322_v63 = vmul.f32 %v321_v56, %v308_v8 }
  0xd3   : > { %v370_v46 = vadd.f32 0.4994258, %v369_v44  ;;  %v359_v59 = vadd.f32 0.18741608, %v358_v53  ;;  %v345_v61 = vor.u32 1.1754944e-38, %v344_v55 }
  0xd4   : > { %vm343_vm4 = vcmp.eq.f32.partialorder %v342_v58, 8.507059e+37 }
  0xd5   : > { %v371_v48 = vmul.f32 %v370_v46, %v351_v23  ;;  %v360_v2 = vmul.f32 %v359_v59, %v351_v23 }
  0xd7   : > { %v655_v49 = vpop.eup %654  ;;  %v372_v52 = vadd.f32 1.0, %v371_v48  ;;  %v361_v10 = vadd.f32 1.1283791, %v360_v2 }
  0xd8   : > { %v334_v51 = vmul.f32 %v655_v49, %v332_v40  ;;  %vm339_vm1 = vweird.f32 %v655_v49 }
  0xd9   : > { %656 = vrcp.f32 %v372_v52  ;;  %vm340_vm3 = vmor %vm338_vm2, %vm339_vm1  ;;  %v384_v6 = vand.u32 2147483648, %v372_v52  ;;  %v382_v12 = vand.u32 2147483647, %v372_v52  ;;  %vm378_vm6 = vweird.f32 %v372_v52 }
  0xda   : > { %v335_v54 = vsub.f32 1.0, %v334_v51  ;;  %v362_v19 = vmul.f32 %v361_v10, %v950_v17 }
  0xdb   : > { %v385_v8 = vor.u32 1.1754944e-38, %v384_v6  ;;  %vm383_vm8 = vcmp.eq.f32.partialorder %v382_v12, 8.507059e+37 }
  0xdc   : > { %v336_v57 = vmul.f32 %v655_v49, %v335_v54  ;;  %v652_v54 = vld [vmem:[%s1007_s3] ss:$0 sm:$0xff] }
  0xde   : > { %v337_v60 = vadd.f32 %v655_v49, %v336_v57  ;;  %v653_v57 = vld [vmem:[%s1008_s4] ss:$0 sm:$0xff] }
  0xdf   : > { %v657_v62 = vpop.eup %656 }
  0xe0   : > { %v341_v0 = vsel %vm340_vm3, %v655_v49, %v337_v60  ;;  %v374_v3 = vmul.f32 %v657_v62, %v372_v52  ;;  %vm379_vm5 = vweird.f32 %v657_v62 }
  0xe1   : > { %v346_v1 = vsel %vm343_vm4, %v345_v61, %v341_v0  ;;  %vm380_vm7 = vmor %vm378_vm6, %vm379_vm5 }
  0xe2   : > { %v347_v4 = vmul.f32 %v346_v1, %v322_v63  ;;  %v375_v5 = vsub.f32 1.0, %v374_v3 }
  0xe4   : > { %v577_v9 = vclamps-f32 %v347_v4, 1.0  ;;  %v376_v11 = vmul.f32 %v657_v62, %v375_v5 }
  0xe6   : > { %v390_v15 = vadd.f32 1.0, %v577_v9  ;;  %v377_v16 = vadd.f32 %v657_v62, %v376_v11 }
  0xe8   : > { %v392_v18 = vmul.f32 %v390_v15, %v306_v13  ;;  %v381_v20 = vsel %vm380_vm7, %v657_v62, %v377_v16 }
  0xe9   : > { %v386_v21 = vsel %vm383_vm8, %v385_v8, %v381_v20 }
  0xea   : > { %v394_v22 = vsel %vm288_vm0, %v392_v18, 0.0  ;;  %v400_v23 = vmul.f32 %v392_v18, %v392_v18  ;;  %v387_v24 = vmul.f32 %v386_v21, %v362_v19 }
  0xeb   : > { %395 = vadd.xlane.f32.xlu0 %v394_v22 }
  0xec   : > { %v402_v25 = vsel %vm288_vm0, %v400_v23, 0.0  ;;  %v578_v26 = vclamps-f32 %v387_v24, 1.0 }
  0xed   : > { %403 = vadd.xlane.f32.xlu1 %v402_v25 }
  0xee   : > { %v391_v27 = vadd.f32 1.0, %v578_v26 }
  0xf0   : > { %v393_v28 = vmul.f32 %v391_v27, %v307_v7 }
  0xf2   : > { %v397_v29 = vsel %vm288_vm0, %v393_v28, 0.0  ;;  %v401_v30 = vmul.f32 %v393_v28, %v393_v28 }
  0xf3   : > { %398 = vadd.xlane.f32.xlu0 %v397_v29 }
  0xf4   : > { %v405_v17 = vsel %vm288_vm0, %v401_v30, 0.0 }
  0xf5   : > { %406 = vadd.xlane.f32.xlu1 %v405_v17 }
 0x15e   : > { %v396_v31 = vpop.xlane.xlu0 %395 }
 0x15f   : > { %v408_v32 = vmul.f32 0.03125, %v396_v31 }
 0x160   : > { %v404_v33 = vpop.xlane.xlu1 %403 }
 0x161   : > { %v412_v34 = vmul.f32 %v408_v32, %v408_v32  ;;  %v410_v35 = vmul.f32 0.03125, %v404_v33  ;;  %v440_v53 = vsub.f32 %v392_v18, %v408_v32 }
 0x163   : > { %v414_v36 = vsub.f32 %v410_v35, %v412_v34 }
 0x165   : > { %v416_v37 = vmax.f32 %v414_v36, 0.0 }
 0x166   : > { %v399_v39 = vpop.xlane.xlu0 %398 }
 0x167   : > { %v418_v38 = vadd.f32 1e-12, %v416_v37  ;;  %v409_v40 = vmul.f32 0.03125, %v399_v39 }
 0x168   : > { %v407_v14 = vpop.xlane.xlu1 %406 }
 0x169   : > { %658 = vrsqrt.f32 %v418_v38  ;;  %v413_v41 = vmul.f32 %v409_v40, %v409_v40  ;;  %v411_v42 = vmul.f32 0.03125, %v407_v14  ;;  %vm426_vm10 = vweird.f32 %v418_v38 }
 0x16a   : > { %v441_v1 = vsub.f32 %v393_v28, %v409_v40 }
 0x16b   : > { %v415_v43 = vsub.f32 %v411_v42, %v413_v41 }
 0x16d   : > { %v417_v44 = vmax.f32 %v415_v43, 0.0 }
 0x16f   : > { %v659_v45 = vpop.eup %658  ;;  %v419_v47 = vadd.f32 1e-12, %v417_v44 }
 0x170   : > { %v421_v46 = vmul.f32 %v659_v45, %v418_v38  ;;  %vm427_vm9 = vweird.f32 %v659_v45 }
 0x171   : > { %660 = vrsqrt.f32 %v419_v47  ;;  %vm428_vm11 = vmor %vm426_vm10, %vm427_vm9  ;;  %vm436_vm13 = vweird.f32 %v419_v47 }
 0x172   : > { %v422_v48 = vmul.f32 %v659_v45, %v421_v46 }
 0x174   : > { %v423_v49 = vmul.f32 0.5, %v422_v48 }
 0x176   : > { %v424_v50 = vsub.f32 1.5, %v423_v49 }
 0x177   : > { %v661_v51 = vpop.eup %660 }
 0x178   : > { %v425_v52 = vmul.f32 %v659_v45, %v424_v50  ;;  %v431_v55 = vmul.f32 %v661_v51, %v419_v47  ;;  %vm437_vm12 = vweird.f32 %v661_v51 }
 0x179   : > { %vm438_vm14 = vmor %vm436_vm13, %vm437_vm12 }
 0x17a   : > { %v429_v56 = vsel %vm428_vm11, %v659_v45, %v425_v52  ;;  %v432_v59 = vmul.f32 %v661_v51, %v431_v55 }
 0x17b   : > { %v442_v58 = vmul.f32 %v440_v53, %v429_v56 }
 0x17c   : > { %v433_v61 = vmul.f32 0.5, %v432_v59 }
 0x17d   : > { %v448_v60 = vmul.f32 %v652_v54, %v442_v58 }
 0x17e   : > { %v434_v63 = vsub.f32 1.5, %v433_v61 }
 0x17f   : > { %v454_v62 = vadd.f32 %v653_v57, %v448_v60 }
 0x180   : > { %v435_v0 = vmul.f32 %v661_v51, %v434_v63 }
 0x181   : > { %456 = vst.msk [vmem:[%s261_s16] sm:$0xff] %vm288_vm0, %v454_v62 }
 0x182   : > { %v439_v2 = vsel %vm438_vm14, %v661_v51, %v435_v0 }
 0x183   : > { %v443_v3 = vmul.f32 %v441_v1, %v439_v2 }
 0x185   : > { %v449_v4 = vmul.f32 %v652_v54, %v443_v3 }
 0x187   : > { %v455_v5 = vadd.f32 %v653_v57, %v449_v4 }
 0x189   : > { %457 = vst.msk [vmem:[%s261_s16 + $0x8] sm:$0xff] %vm288_vm0, %v455_v5 }
 0x18a   : > { %749 = shalt.err (!%p746_p10)
}
 0x18b   : > { %s799_s28 = smov 128   ;;  %s800_s8 = smov 8  }
 0x18c   : > { %594 = dma.vmem_to_hbm [thread:$0]  (%p898_p7), %s472_s22, 256, %s474_s26, %s459_s9, %s799_s28, %s799_s28, %s800_s8  }
 0x18d PF: > { %s488_s15 = sand.u32 1, %s780_s18   ;;  %p1015_p12 = scmp.ge.s32.totalorder %s792_s21, 2 }
 0x18e   : > { %s489_s16 = scalar_lea.sflag [#allocation4], %s488_s15 }
 0x18f   : > { %p605_p13 = pnand %p1015_p12, %p866_p6 }
 0x191   : > { %p606_p0 = pneg %p605_p13 }
 0x193   : > { %775 = dma.done.wait (%p606_p0), %s489_s16, 256  }
 0x194   : > { %777 = vsyncadd (%p606_p0), %s489_s16, 4294967040  ;;  %p19_p3 = scmp.ge.s32.totalorder %s884_s7, 4   ;;  %s1016_s18 = smov %s784_s19 }
 0x195   : > { %s1017_s19 = smov %s788_s20  ;;  %s1018_s20 = smov %s894_s12 }
 0x196   : > { %s1019_s21 = smov %s884_s7  ;;  %21 = sbr.rel (!%p19_p3) target bundleno = 6 (0x6), region = 89 }
 0x19b   :  { %495 = vsyncpa [#allocation3], 1 }
 0x19c   :  { %497 = vsyncpa [#allocation3 + $0x1], 1 }
 0x19d   :  { %498 = vsyncpa [#allocation6], 1 }
 0x19e   :  { %499 = vsyncpa [#allocation4], 1 }
 0x19f   :  { %501 = vsyncpa [#allocation4 + $0x1], 1 }

// kernel: tpu_custom_call.1
= control target key start
LH: loop header
LB: loop body
LE: loop exit
PB: predicated region body
PF: predicated region fallthrough
CT: control target
= control target key end

     0   :  { %10 = vsyncpa [#allocation3], 0  ;;  %s1004_s0 = inlined_call_operand.hbm [shape: f32[32,32], index: 0, kind: input, shape index: {}]   ;;  %s1005_s1 = inlined_call_operand.hbm [shape: bf16[32,32], index: 1, kind: input, shape index: {}]   ;;  %s1006_s2 = inlined_call_operand.vmem [shape: f32[1,32], index: 2, kind: input, shape index: {}]   ;;  %s1007_s3 = inlined_call_operand.vmem [shape: f32[1,32], index: 3, kind: input, shape index: {}]   ;;  %s1008_s4 = inlined_call_operand.vmem [shape: f32[1,32], index: 4, kind: input, shape index: {}]   ;;  %s1009_s5 = inlined_call_operand.hbm [shape: f32[32,32], index: 5, kind: output, shape index: {}]  }
   0x1   :  { %12 = vsyncpa [#allocation3 + $0x1], 0 }
   0x2   :  { %13 = vsyncpa [#allocation6], 0 }
   0x3   :  { %14 = vsyncpa [#allocation4], 0 }
   0x4   :  { %16 = vsyncpa [#allocation4 + $0x1], 0  ;;  %s831_s18 = smov 0   ;;  %s833_s19 = smov 0  }
   0x5   :  { %s835_s20 = smov 0   ;;  %s837_s21 = smov 0  }
   0x6 LB: > { %s852_s22 = sadd.s32 4294967295, %s792_s21   ;;  %s557_s23 = sadd.s32 4294967294, %s792_s21   ;;  %s792_s21 = sphi %s837_s21, %s1019_s21   ;;  %s788_s20 = sphi %s835_s20, %s1018_s20   ;;  %s784_s19 = sphi %s833_s19, %s1017_s19   ;;  %s780_s18 = sphi %s831_s18, %s1016_s18  }
   0x7   : > { %p42_p0 = scmp.ne.s32.totalorder %s784_s19, %s780_s18  ;;  %p43_p1 = scmp.eq.s32.totalorder %s852_s22, 0 }
   0x8   : > { %p150_p2 = scmp.eq.s32.totalorder %s852_s22, 1  ;;  %p156_p3 = scmp.eq.s32.totalorder %s557_s23, 1 }
   0x9   : > { %p861_p4 = por %p43_p1, %p42_p0  ;;  %p558_p5 = scmp.ge.s32.totalorder %s792_s21, 1 }
   0xa   : > { %p866_p6 = por %p156_p3, %p42_p0  ;;  %p163_p7 = scmp.lt.s32.totalorder %s792_s21, 3 }
   0xb   : > { %s174_s28 = sshll.u32 %s1005_s1, 4  ;;  %s794_s30 = smov [#allocation5]   ;;  %s175_s28 = int_to_ptr.hbm [resolvable:$true] %s174_s28 }
   0xc   : > { %p874_p8 = pnand %p558_p5, %p163_p7  ;;  %s176_s6 = sshll.u32 %s794_s30, 4  ;;  %s177_s6 = int_to_ptr.vmem [resolvable:$true] %s176_s6 }
   0xd   : > { %s884_s7 = sadd.s32 1, %s792_s21   ;;  %s795_s8 = smov 64  }
   0xe   : > { %p596_p9 = pneg %p874_p8  ;;  %s796_s9 = smov 4  }
   0xf   : > { %s26_s10 = ssub.s32 %s792_s21, %s884_s7  ;;  %s29_s11 = sadd.s32 1, %s788_s20 }
  0x10   : > { %p597_p10 = pnand %p596_p9, %p43_p1  ;;  %p27_p12 = scmp.eq.s32.totalorder %s26_s10, 0 }
  0x11   : > { %p36_p13 = scmp.ne.s32.totalorder %s788_s20, %s784_s19  ;;  %p37_p0 = scmp.eq.s32.totalorder %s792_s21, 0 }
  0x12   : > { %599 = dma.hbm_to_vmem [thread:$0]  (!%p597_p10), %s175_s28, 256, %s177_s6, [#allocation6], %s795_s8, %s795_s8, %s796_s9  }
  0x13   : > { %p609_p3 = scmp.lt.s32.totalorder %s792_s21, 2  ;;  %p38_p5 = por %p37_p0, %p36_p13 }
  0x14   : > { %s894_s12 = scalar_select %p27_p12, %s788_s20, %s29_s11  }
  0x15   : > { %p898_p7 = por %p150_p2, %p36_p13  ;;  %s199_s14 = sand.u32 1, %s788_s20  }
  0x16   : > { %s584_s15 = sshll.u32 %s792_s21, 4  ;;  %s561_s16 = sshll.u32 %s199_s14, 4 }
  0x17   : > { %s208_s26 = scalar_lea.hbm %s1004_s0, %s584_s15  ;;  %s203_s28 = scalar_lea.vmem [#allocation2], %s561_s16 }
  0x18   : > { %s209_s27 = sshll.u32 %s208_s26, 4  ;;  %s211_s30 = sshll.u32 %s203_s28, 4  ;;  %s210_s27 = int_to_ptr.hbm [resolvable:$true] %s209_s27  ;;  %s212_s30 = int_to_ptr.vmem [resolvable:$true] %s211_s30 }
  0x19   : > { %p909_p9 = pnand %p609_p3, %p38_p5  ;;  %s200_s8 = scalar_lea.sflag [#allocation3], %s199_s14 }
  0x1a   : > { %s692_s9 = sshra.s32 %s210_s27, 4  ;;  %s699_s16 = scalar_lea.hbm %s1004_s0, 32  ;;  %s693_s9 = int_to_ptr.hbm [resolvable:$true] %s692_s9 }
  0x1b   : > { %s694_s10 = scalar_lea.hbm %s693_s9, 16  ;;  %p696_p10 = pneg %p909_p9 }
  0x1c   : > { %p695_p2 = scmp.ne.s32.totalorder %s693_s9, %s694_s10  ;;  %p700_p0 = scmp.lt.s32.totalorder %s693_s9, %s1004_s0 }
  0x1d   : > { %p701_p3 = scmp.lt.s32.totalorder %s699_s16, %s694_s10 }
  0x1e   : > { %p697_p12 = pnand %p696_p10, %p695_p2 }
  0x1f   : > { %p702_p5 = por %p701_p3, %p700_p0 }
  0x20   : > { %p698_p13 = pneg %p697_p12 }
  0x22   : > { %p703_p11 = pnand %p702_p5, %p698_p13 }
  0x24   : > { %706 = shalt.err (!%p703_p11)
}
  0x25   : > { %s797_s14 = smov 128   ;;  %s798_s26 = smov 8  }
  0x26   : > { %603 = dma.hbm_to_vmem [thread:$0]  (!%p909_p9), %s210_s27, 256, %s212_s30, %s200_s8, %s797_s14, %s797_s14, %s798_s26  }
  0x27   : > { %223 = sbr.rel (%p874_p8) target bundleno = 397 (0x18d), region = 40  ;;  %s926_s28 = sand.u32 (!%p874_p8), 1, %s784_s19  }
  0x28   : > { %s565_s9 = sshll.u32 (!%p874_p8), %s926_s28, 4  ;;  %s226_s10 = scalar_lea.sflag (!%p874_p8), [#allocation3], %s926_s28 }
  0x29   : > { %s229_s11 = scalar_lea.vmem (!%p874_p8), [#allocation2], %s565_s9 }
  0x2c   : > { %767 = dma.done.wait (%p861_p4), %s226_s10, 256  }
  0x2d   : > { %769 = vsyncadd (%p861_p4), %s226_s10, 4294967040 }
  0x2e   : > { %771 = dma.done.wait (%p43_p1), [#allocation6], 256  }
  0x2f   : > { %773 = vsyncadd (%p43_p1), [#allocation6], 4294967040  ;;  %v586_v0 = vld [vmem:[#allocation5 + $0x8] sm:$0xff]  ;;  %v585_v1 = vld [vmem:[#allocation5] sm:$0xff]  ;;  %vm288_vm0 = vcmask 261120   ;;  %s587_s15 = sshll.u32 %s852_s22, 4 }
  0x30   : > { %v265_v2 = vld [vmem:[%s229_s11] sm:$0xff]  ;;  %298 = vmatpush.bf16.msra.mxu0 %v586_v0  ;;  %v266_v3 = vld [vmem:[%s229_s11 + $0x8] sm:$0xff]  ;;  %s261_s16 = scalar_lea.vmem [#allocation7], %s565_s9  ;;  %s470_s14 = scalar_lea.hbm %s1009_s5, %s587_s15 }
  0x31   : > { %v267_v4 = vpack.c.bf16 %v266_v3, %v265_v2  ;;  %v651_v5 = vld [vmem:[%s1006_s2] ss:$0 sm:$0xff]  ;;  %s471_s22 = sshll.u32 %s261_s16, 4  ;;  %s473_s26 = sshll.u32 %s470_s14, 4  ;;  %s472_s22 = int_to_ptr.vmem [resolvable:$true] %s471_s22  ;;  %s474_s26 = int_to_ptr.hbm [resolvable:$true] %s473_s26 }
  0x32   : > { %s459_s9 = scalar_lea.sflag [#allocation4], %s926_s28  ;;  %s736_s10 = sshra.s32 %s474_s26, 4  ;;  %s737_s10 = int_to_ptr.hbm [resolvable:$true] %s736_s10 }
  0x33   : > { %s738_s11 = scalar_lea.hbm %s737_s10, 16  ;;  %s742_s24 = scalar_lea.hbm %s1009_s5, 32 }
  0x34   : > { %299 = vmatpush.bf16.msra.mxu0 %v585_v1  ;;  %p739_p1 = scmp.ne.s32.totalorder %s737_s10, %s738_s11  ;;  %p743_p11 = scmp.lt.s32.totalorder %s737_s10, %s1009_s5 }
  0x35   : > { %p744_p9 = scmp.lt.s32.totalorder %s742_s24, %s738_s11 }
  0x36   : > { %p740_p4 = pnand %p739_p1, %p898_p7 }
  0x37   : > { %576 = vmatmul.msk.bf16.vlgmr.msra.gmra.mxu0 %vm288_vm0, %v267_v4  ;;  %p745_p2 = por %p744_p9, %p743_p11 }
  0x38   : > { %p741_p8 = pneg %p740_p4 }
  0x3a   : > { %p746_p10 = pnand %p745_p2, %p741_p8 }
  0xb4   : > { %v301_v6 = vpop.f32.mrf.mxu0 }
  0xb5   : > { %v944_v7 = vadd.f32 %v651_v5, %v301_v6 }
  0xb7   : > { %v308_v8 = vmul.f32 0.70710677, %v944_v7 }
  0xb9   : > { %v310_v9 = vmul.f32 %v308_v8, %v308_v8 }
  0xbb   : > { %v311_v10 = vmin.f32 %v310_v9, 16.0 }
  0xbc   : > { %v303_v11 = vpop.f32.mrf.mxu0 }
  0xbd   : > { %v312_v12 = vmul.f32 2.1237322e-06, %v311_v10  ;;  %v323_v13 = vmul.f32 3.8918573e-05, %v311_v10  ;;  %v947_v14 = vadd.f32 %v651_v5, %v303_v11 }
  0xbf   : > { %v313_v15 = vadd.f32 0.00028619796, %v312_v12  ;;  %v324_v16 = vadd.f32 0.001143296, %v323_v13  ;;  %v950_v17 = vmul.f32 0.70710677, %v947_v14 }
  0xc0   : > { %v306_v13 = vmul.f32 0.5, %v944_v7  ;;  %v307_v7 = vmul.f32 0.5, %v947_v14 }
  0xc1   : > { %v314_v18 = vmul.f32 %v313_v15, %v311_v10  ;;  %v325_v19 = vmul.f32 %v324_v16, %v311_v10  ;;  %v350_v20 = vmul.f32 %v950_v17, %v950_v17 }
  0xc3   : > { %v326_v21 = vadd.f32 0.014752088, %v325_v19  ;;  %v315_v22 = vadd.f32 0.0036580483, %v314_v18  ;;  %v351_v23 = vmin.f32 %v350_v20, 16.0 }
  0xc5   : > { %v327_v24 = vmul.f32 %v326_v21, %v311_v10  ;;  %v352_v25 = vmul.f32 2.1237322e-06, %v351_v23  ;;  %v363_v26 = vmul.f32 3.8918573e-05, %v351_v23  ;;  %v316_v28 = vmul.f32 %v315_v22, %v311_v10 }
  0xc7   : > { %v328_v27 = vadd.f32 0.112945676, %v327_v24  ;;  %v353_v29 = vadd.f32 0.00028619796, %v352_v25  ;;  %v364_v30 = vadd.f32 0.001143296, %v363_v26 }
  0xc8   : > { %v317_v35 = vadd.f32 0.05243302, %v316_v28 }
  0xc9   : > { %v329_v31 = vmul.f32 %v328_v27, %v311_v10  ;;  %v354_v32 = vmul.f32 %v353_v29, %v351_v23  ;;  %v365_v33 = vmul.f32 %v364_v30, %v351_v23 }
  0xca   : > { %v318_v41 = vmul.f32 %v317_v35, %v311_v10 }
  0xcb   : > { %v330_v34 = vadd.f32 0.4994258, %v329_v31  ;;  %v366_v36 = vadd.f32 0.014752088, %v365_v33  ;;  %v355_v38 = vadd.f32 0.0036580483, %v354_v32 }
  0xcc   : > { %v319_v45 = vadd.f32 0.18741608, %v318_v41 }
  0xcd   : > { %v331_v37 = vmul.f32 %v330_v34, %v311_v10  ;;  %v367_v39 = vmul.f32 %v366_v36, %v351_v23  ;;  %v356_v43 = vmul.f32 %v355_v38, %v351_v23 }
  0xce   : > { %v320_v50 = vmul.f32 %v319_v45, %v311_v10 }
  0xcf   : > { %v332_v40 = vadd.f32 1.0, %v331_v37  ;;  %v368_v42 = vadd.f32 0.112945676, %v367_v39  ;;  %v357_v47 = vadd.f32 0.05243302, %v356_v43 }
  0xd0   : > { %v321_v56 = vadd.f32 1.1283791, %v320_v50 }
  0xd1   : > { %654 = vrcp.f32 %v332_v40  ;;  %v369_v44 = vmul.f32 %v368_v42, %v351_v23  ;;  %v358_v53 = vmul.f32 %v357_v47, %v351_v23  ;;  %v344_v55 = vand.u32 2147483648, %v332_v40 }
  0xd2   : > { %v342_v58 = vand.u32 2147483647, %v332_v40  ;;  %vm338_vm2 = vweird.f32 %v332_v40  ;;  %v322_v63 = vmul.f32 %v321_v56, %v308_v8 }
  0xd3   : > { %v370_v46 = vadd.f32 0.4994258, %v369_v44  ;;  %v359_v59 = vadd.f32 0.18741608, %v358_v53  ;;  %v345_v61 = vor.u32 1.1754944e-38, %v344_v55 }
  0xd4   : > { %vm343_vm4 = vcmp.eq.f32.partialorder %v342_v58, 8.507059e+37 }
  0xd5   : > { %v371_v48 = vmul.f32 %v370_v46, %v351_v23  ;;  %v360_v2 = vmul.f32 %v359_v59, %v351_v23 }
  0xd7   : > { %v655_v49 = vpop.eup %654  ;;  %v372_v52 = vadd.f32 1.0, %v371_v48  ;;  %v361_v10 = vadd.f32 1.1283791, %v360_v2 }
  0xd8   : > { %v334_v51 = vmul.f32 %v655_v49, %v332_v40  ;;  %vm339_vm1 = vweird.f32 %v655_v49 }
  0xd9   : > { %656 = vrcp.f32 %v372_v52  ;;  %vm340_vm3 = vmor %vm338_vm2, %vm339_vm1  ;;  %v384_v6 = vand.u32 2147483648, %v372_v52  ;;  %v382_v12 = vand.u32 2147483647, %v372_v52  ;;  %vm378_vm6 = vweird.f32 %v372_v52 }
  0xda   : > { %v335_v54 = vsub.f32 1.0, %v334_v51  ;;  %v362_v19 = vmul.f32 %v361_v10, %v950_v17 }
  0xdb   : > { %v385_v8 = vor.u32 1.1754944e-38, %v384_v6  ;;  %vm383_vm8 = vcmp.eq.f32.partialorder %v382_v12, 8.507059e+37 }
  0xdc   : > { %v336_v57 = vmul.f32 %v655_v49, %v335_v54  ;;  %v652_v54 = vld [vmem:[%s1007_s3] ss:$0 sm:$0xff] }
  0xde   : > { %v337_v60 = vadd.f32 %v655_v49, %v336_v57  ;;  %v653_v57 = vld [vmem:[%s1008_s4] ss:$0 sm:$0xff] }
  0xdf   : > { %v657_v62 = vpop.eup %656 }
  0xe0   : > { %v341_v0 = vsel %vm340_vm3, %v655_v49, %v337_v60  ;;  %v374_v3 = vmul.f32 %v657_v62, %v372_v52  ;;  %vm379_vm5 = vweird.f32 %v657_v62 }
  0xe1   : > { %v346_v1 = vsel %vm343_vm4, %v345_v61, %v341_v0  ;;  %vm380_vm7 = vmor %vm378_vm6, %vm379_vm5 }
  0xe2   : > { %v347_v4 = vmul.f32 %v346_v1, %v322_v63  ;;  %v375_v5 = vsub.f32 1.0, %v374_v3 }
  0xe4   : > { %v577_v9 = vclamps-f32 %v347_v4, 1.0  ;;  %v376_v11 = vmul.f32 %v657_v62, %v375_v5 }
  0xe6   : > { %v390_v15 = vadd.f32 1.0, %v577_v9  ;;  %v377_v16 = vadd.f32 %v657_v62, %v376_v11 }
  0xe8   : > { %v392_v18 = vmul.f32 %v390_v15, %v306_v13  ;;  %v381_v20 = vsel %vm380_vm7, %v657_v62, %v377_v16 }
  0xe9   : > { %v386_v21 = vsel %vm383_vm8, %v385_v8, %v381_v20 }
  0xea   : > { %v394_v22 = vsel %vm288_vm0, %v392_v18, 0.0  ;;  %v400_v23 = vmul.f32 %v392_v18, %v392_v18  ;;  %v387_v24 = vmul.f32 %v386_v21, %v362_v19 }
  0xeb   : > { %395 = vadd.xlane.f32.xlu0 %v394_v22 }
  0xec   : > { %v402_v25 = vsel %vm288_vm0, %v400_v23, 0.0  ;;  %v578_v26 = vclamps-f32 %v387_v24, 1.0 }
  0xed   : > { %403 = vadd.xlane.f32.xlu1 %v402_v25 }
  0xee   : > { %v391_v27 = vadd.f32 1.0, %v578_v26 }
  0xf0   : > { %v393_v28 = vmul.f32 %v391_v27, %v307_v7 }
  0xf2   : > { %v397_v29 = vsel %vm288_vm0, %v393_v28, 0.0  ;;  %v401_v30 = vmul.f32 %v393_v28, %v393_v28 }
  0xf3   : > { %398 = vadd.xlane.f32.xlu0 %v397_v29 }
  0xf4   : > { %v405_v17 = vsel %vm288_vm0, %v401_v30, 0.0 }
  0xf5   : > { %406 = vadd.xlane.f32.xlu1 %v405_v17 }
 0x15e   : > { %v396_v31 = vpop.xlane.xlu0 %395 }
 0x15f   : > { %v408_v32 = vmul.f32 0.03125, %v396_v31 }
 0x160   : > { %v404_v33 = vpop.xlane.xlu1 %403 }
 0x161   : > { %v412_v34 = vmul.f32 %v408_v32, %v408_v32  ;;  %v410_v35 = vmul.f32 0.03125, %v404_v33  ;;  %v440_v53 = vsub.f32 %v392_v18, %v408_v32 }
 0x163   : > { %v414_v36 = vsub.f32 %v410_v35, %v412_v34 }
 0x165   : > { %v416_v37 = vmax.f32 %v414_v36, 0.0 }
 0x166   : > { %v399_v39 = vpop.xlane.xlu0 %398 }
 0x167   : > { %v418_v38 = vadd.f32 1e-12, %v416_v37  ;;  %v409_v40 = vmul.f32 0.03125, %v399_v39 }
 0x168   : > { %v407_v14 = vpop.xlane.xlu1 %406 }
 0x169   : > { %658 = vrsqrt.f32 %v418_v38  ;;  %v413_v41 = vmul.f32 %v409_v40, %v409_v40  ;;  %v411_v42 = vmul.f32 0.03125, %v407_v14  ;;  %vm426_vm10 = vweird.f32 %v418_v38 }
 0x16a   : > { %v441_v1 = vsub.f32 %v393_v28, %v409_v40 }
 0x16b   : > { %v415_v43 = vsub.f32 %v411_v42, %v413_v41 }
 0x16d   : > { %v417_v44 = vmax.f32 %v415_v43, 0.0 }
 0x16f   : > { %v659_v45 = vpop.eup %658  ;;  %v419_v47 = vadd.f32 1e-12, %v417_v44 }
 0x170   : > { %v421_v46 = vmul.f32 %v659_v45, %v418_v38  ;;  %vm427_vm9 = vweird.f32 %v659_v45 }
 0x171   : > { %660 = vrsqrt.f32 %v419_v47  ;;  %vm428_vm11 = vmor %vm426_vm10, %vm427_vm9  ;;  %vm436_vm13 = vweird.f32 %v419_v47 }
 0x172   : > { %v422_v48 = vmul.f32 %v659_v45, %v421_v46 }
 0x174   : > { %v423_v49 = vmul.f32 0.5, %v422_v48 }
 0x176   : > { %v424_v50 = vsub.f32 1.5, %v423_v49 }
 0x177   : > { %v661_v51 = vpop.eup %660 }
 0x178   : > { %v425_v52 = vmul.f32 %v659_v45, %v424_v50  ;;  %v431_v55 = vmul.f32 %v661_v51, %v419_v47  ;;  %vm437_vm12 = vweird.f32 %v661_v51 }
 0x179   : > { %vm438_vm14 = vmor %vm436_vm13, %vm437_vm12 }
 0x17a   : > { %v429_v56 = vsel %vm428_vm11, %v659_v45, %v425_v52  ;;  %v432_v59 = vmul.f32 %v661_v51, %v431_v55 }
 0x17b   : > { %v442_v58 = vmul.f32 %v440_v53, %v429_v56 }
 0x17c   : > { %v433_v61 = vmul.f32 0.5, %v432_v59 }
 0x17d   : > { %v448_v60 = vmul.f32 %v652_v54, %v442_v58 }
 0x17e   : > { %v434_v63 = vsub.f32 1.5, %v433_v61 }
 0x17f   : > { %v454_v62 = vadd.f32 %v653_v57, %v448_v60 }
 0x180   : > { %v435_v0 = vmul.f32 %v661_v51, %v434_v63 }
 0x181   : > { %456 = vst.msk [vmem:[%s261_s16] sm:$0xff] %vm288_vm0, %v454_v62 }
 0x182   : > { %v439_v2 = vsel %vm438_vm14, %v661_v51, %v435_v0 }
 0x183   : > { %v443_v3 = vmul.f32 %v441_v1, %v439_v2 }
 0x185   : > { %v449_v4 = vmul.f32 %v652_v54, %v443_v3 }
 0x187   : > { %v455_v5 = vadd.f32 %v653_v57, %v449_v4 }
 0x189   : > { %457 = vst.msk [vmem:[%s261_s16 + $0x8] sm:$0xff] %vm288_vm0, %v455_v5 }
 0x18a   : > { %749 = shalt.err (!%p746_p10)
}
 0x18b   : > { %s799_s28 = smov 128   ;;  %s800_s8 = smov 8  }
 0x18c   : > { %594 = dma.vmem_to_hbm [thread:$0]  (%p898_p7), %s472_s22, 256, %s474_s26, %s459_s9, %s799_s28, %s799_s28, %s800_s8  }
 0x18d PF: > { %s488_s15 = sand.u32 1, %s780_s18   ;;  %p1015_p12 = scmp.ge.s32.totalorder %s792_s21, 2 }
 0x18e   : > { %s489_s16 = scalar_lea.sflag [#allocation4], %s488_s15 }
 0x18f   : > { %p605_p13 = pnand %p1015_p12, %p866_p6 }
 0x191   : > { %p606_p0 = pneg %p605_p13 }
 0x193   : > { %775 = dma.done.wait (%p606_p0), %s489_s16, 256  }
 0x194   : > { %777 = vsyncadd (%p606_p0), %s489_s16, 4294967040  ;;  %p19_p3 = scmp.ge.s32.totalorder %s884_s7, 4   ;;  %s1016_s18 = smov %s784_s19 }
 0x195   : > { %s1017_s19 = smov %s788_s20  ;;  %s1018_s20 = smov %s894_s12 }
 0x196   : > { %s1019_s21 = smov %s884_s7  ;;  %21 = sbr.rel (!%p19_p3) target bundleno = 6 (0x6), region = 89 }
 0x19b   :  { %495 = vsyncpa [#allocation3], 1 }
 0x19c   :  { %497 = vsyncpa [#allocation3 + $0x1], 1 }
 0x19d   :  { %498 = vsyncpa [#allocation6], 1 }
 0x19e   :  { %499 = vsyncpa [#allocation4], 1 }
 0x19f   :  { %501 = vsyncpa [#allocation4 + $0x1], 1 }

</bundles_post_ra>
